<compile_context>
chip_gen: v7x
topology: tpu7x:2x2x1
jax: 0.10.0
libtpu: 0.0.40
codegen_flags: <defaults>
</compile_context>

<pallas_src>
import jax
import jax.numpy as jnp
from jax.experimental import pallas as pl
from jax.experimental.pallas import tpu as pltpu

NEG_RATIO = 5.0
EPS = 1e-8
LANE = 128
SUBLANE = 16            # 16-row granularity -> bf16 blocks stay tile-aligned
MAX_BLOCK_ROWS = 4096   # (4096,128) f32 = 2 MiB/buffer; ~14 MiB double-buffered


def _cdiv(a, b):
    return -(-a // b)


def _round_up(a, b):
    return _cdiv(a, b) * b


def _make_kernel(block_rows: int, rows: int, needs_tail_mask: bool):
    """Elementwise BCE + per-block partial reductions for one (block_rows,128) tile."""

    def kernel(pred_ref, tcode_ref, mask_ref,
               neg_loss_ref, pos_sum_ref, pos_cnt_ref, neg_cnt_ref, neg_max_ref):
        pred = pred_ref[...]                          # f32 probabilities
        tcode = tcode_ref[...].astype(jnp.float32)    # {0,1,2} class code (bf16 in HBM)
        msk = mask_ref[...]                           # f32 (arbitrary float masks OK)

        pos_idx = (tcode == 1.0).astype(jnp.float32)
        neg_idx = (tcode == 0.0).astype(jnp.float32)

        # Single-log BCE: only target==1 / target==0 elements ever reach an
        # output, so the two-term BCE collapses to one log per element
        # (PyTorch clamps log() at -100).  code==2 elements contribute nothing.
        p_sel = jnp.where(tcode == 1.0, pred, 1.0 - pred)

        if needs_tail_mask:
            # Last grid block overruns `rows`: one iota + one compare, folded
            # into the selection masks (cheap; only compiled in when needed).
            row_ids = jax.lax.broadcasted_iota(jnp.int32, (block_rows, LANE), 0)
            valid = (pl.program_id(0) * block_rows + row_ids) < rows
            valid_f = valid.astype(jnp.float32)
            p_sel = jnp.where(valid, p_sel, 1.0)      # keep log() NaN/Inf-free
            msk = msk * valid_f
            pos_idx = pos_idx * valid_f
            neg_idx = neg_idx * valid_f

        loss = -jnp.maximum(jnp.log(p_sel), -100.0) * msk
        neg_loss = loss * neg_idx
        neg_loss_ref[...] = neg_loss

        def fold_sum(x):
            # (block_rows,128) -> (1,8,128) per-block partial (sublane-group adds
            # only; the tiny final reduction happens in JAX).
            return jnp.sum(x.reshape(block_rows // 8, 8, LANE), axis=0)[None]

        pos_sum_ref[...] = fold_sum(loss * pos_idx)
        pos_cnt_ref[...] = fold_sum(pos_idx)
        neg_cnt_ref[...] = fold_sum(neg_idx)
        neg_max_ref[...] = jnp.max(
            neg_loss.reshape(block_rows // 8, 8, LANE), axis=0)[None]

    return kernel


def balance_bce_loss(pred, target, mask,
                     negative_ratio=NEG_RATIO, eps=EPS,
                     max_block_rows=MAX_BLOCK_ROWS,
                     refine_bins=32, refine_levels=4):
    n_elem = pred.size
    chunk = SUBLANE * LANE
    pad = (-n_elem) % chunk

    pred_f = pred.reshape(-1).astype(jnp.float32)
    tgt_f = target.reshape(-1).astype(jnp.float32)
    msk_f = mask.reshape(-1).astype(jnp.float32)

    # Compact class code (bf16, exact for {0,1,2}): preserves the ==1.0/==0.0
    # semantics for arbitrary float targets at half the kernel input bytes.
    tcode = jnp.where(tgt_f == 1.0, 1.0,
                      jnp.where(tgt_f == 0.0, 0.0, 2.0)).astype(jnp.bfloat16)

    if pad:
        # TODO(synk): handle the ragged element tail in-kernel (1-D blocks +
        # flat-index masking) instead of this full-array pad copy.
        pred_f = jnp.pad(pred_f, (0, pad), constant_values=0.5)   # finite log
        tcode = jnp.pad(tcode, (0, pad), constant_values=2.0)     # neither pos nor neg
        msk_f = jnp.pad(msk_f, (0, pad), constant_values=0.0)     # zero loss

    pred2 = pred_f.reshape(-1, LANE)
    tcode2 = tcode.reshape(-1, LANE)
    mask2 = msk_f.reshape(-1, LANE)
    rows = pred2.shape[0]

    # >=2 blocks whenever rows >= 32 so the ("parallel",) axis can shard across
    # both v7x TensorCores; cap the block so double-buffered VMEM stays ~14 MiB.
    target_blocks = max(2, _cdiv(rows, max_block_rows))
    block_rows = min(rows, _round_up(_cdiv(rows, target_blocks), SUBLANE))
    num_blocks = _cdiv(rows, block_rows)
    needs_tail_mask = (rows % block_rows) != 0

    kernel = _make_kernel(block_rows, rows, needs_tail_mask)

    tile_spec = pl.BlockSpec((block_rows, LANE), lambda i: (i, 0))
    part_spec = pl.BlockSpec((1, 8, LANE), lambda i: (i, 0, 0))
    part_shape = jax.ShapeDtypeStruct((num_blocks, 8, LANE), jnp.float32)

    neg_loss, pos_sum_p, pos_cnt_p, neg_cnt_p, neg_max_p = pl.pallas_call(
        kernel,
        grid=(num_blocks,),
        in_specs=[tile_spec, tile_spec, tile_spec],
        out_specs=(tile_spec, part_spec, part_spec, part_spec, part_spec),
        out_shape=(
            jax.ShapeDtypeStruct((rows, LANE), jnp.float32),
            part_shape, part_shape, part_shape, part_shape,
        ),
        compiler_params=pltpu.CompilerParams(
            dimension_semantics=("parallel",),
            vmem_limit_bytes=32 * 1024 * 1024,
        ),
    )(pred2, tcode2, mask2)

    # Tiny final reductions over the per-block partials.
    pos_sum = jnp.sum(pos_sum_p)
    pos_cnt = jnp.sum(pos_cnt_p)
    neg_total = jnp.sum(neg_cnt_p)
    neg_max = jnp.max(neg_max_p)

    # negative_count = min(int(negative_index.sum()), int(positive_count * ratio))
    k = jnp.minimum(neg_total, jnp.floor(pos_cnt * negative_ratio))

    # ---- sort-free dynamic-k top-k over the negative losses ----------------
    # Bracketed threshold refinement: each level evaluates exact cnt(>t) and
    # sum(>t) at refine_bins+1 thresholds spanning the current bracket and
    # keeps the bin straddling rank k.  After refine_levels levels the bracket
    # is (max_loss / refine_bins**refine_levels) wide; everything above it is
    # summed exactly and the few stragglers inside it are credited at the
    # bracket mean (exact when the bracket holds a single distinct value).
    neg_flat = neg_loss.reshape(-1)
    frac = jnp.arange(refine_bins + 1, dtype=jnp.float32) / refine_bins
    is_last = jnp.arange(refine_bins + 1) == refine_bins

    lo = jnp.float32(0.0)
    hi = jnp.maximum(neg_max, jnp.float32(1e-30))
    cnt_a = sum_a = cnt_b = sum_b = jnp.float32(0.0)
    for _ in range(refine_levels):
        edges = lo + (hi - lo) * frac
        edges = jnp.where(is_last, hi, edges)          # exact top edge
        gt = neg_flat[:, None] > edges[None, :]
        cnt = jnp.sum(gt, axis=0, dtype=jnp.float32)
        sm = jnp.sum(jnp.where(gt, neg_flat[:, None], 0.0), axis=0,
                     dtype=jnp.float32)
        a = jnp.argmax(cnt <= k)                       # first edge at/below rank k
        ap = jnp.maximum(a - 1, 0)
        cnt_a, sum_a = cnt[a], sm[a]
        cnt_b, sum_b = cnt[ap], sm[ap]
        lo, hi = edges[ap], edges[a]

    m = jnp.maximum(k - cnt_a, 0.0)                    # stragglers inside the bracket
    bin_cnt = jnp.maximum(cnt_b - cnt_a, 1.0)
    bin_mean = jnp.clip((sum_b - sum_a) / bin_cnt, lo, hi)
    neg_topk_sum = sum_a + m * bin_mean

    return (pos_sum + neg_topk_sum) / (pos_cnt + k + eps)


def _reference(pred, target, mask, negative_ratio=NEG_RATIO, eps=EPS):
    """Pure-JAX port of the PyTorch module (exact sort-based top-k)."""
    p = pred.astype(jnp.float32)
    t = target.astype(jnp.float32)
    m = mask.astype(jnp.float32)
    loss = -(t * jnp.maximum(jnp.log(p), -100.0)
             + (1.0 - t) * jnp.maximum(jnp.log(1.0 - p), -100.0))
    loss = loss * m
    pos = (t == 1.0).astype(jnp.float32)
    neg = (t == 0.0).astype(jnp.float32)
    pos_cnt = jnp.sum(pos)
    neg_total = jnp.sum(neg)
    k = jnp.minimum(neg_total, jnp.floor(pos_cnt * negative_ratio))
    neg_loss = (loss * neg).reshape(-1)
    sorted_desc = -jnp.sort(-neg_loss)
    keep = jnp.arange(sorted_desc.shape[0], dtype=jnp.float32) < k
    neg_sum = jnp.sum(jnp.where(keep, sorted_desc, 0.0))
    return (jnp.sum(loss * pos) + neg_sum) / (pos_cnt + k + eps)


if __name__ == "__main__":
    key = jax.random.PRNGKey(0)
    k1, k2, k3 = jax.random.split(key, 3)

    shape = (2, 4, 16, 16)  # NCHW
    pred = jax.nn.sigmoid(jax.random.normal(k1, shape, dtype=jnp.float32))
    target = (jax.random.uniform(k2, shape) < 0.1).astype(jnp.float32)  # 0/1 map
    mask = (jax.random.uniform(k3, shape) < 0.8).astype(jnp.float32)

    loss_fn = jax.jit(balance_bce_loss)
    out = jax.block_until_ready(loss_fn(pred, target, mask))

    ref = jax.block_until_ready(_reference(pred, target, mask))
    assert jnp.isfinite(out), "non-finite loss"
    assert jnp.allclose(out, ref, rtol=2e-4, atol=1e-6), (out, ref)

    print("KERNEL_OK")
</pallas_src>

<mosaic_0001>
module attributes {stable_mosaic.version = 11 : i64} {
  func.func @kernel(%arg0: i32, %arg1: memref<16x128xf32, #tpu.memory_space<vmem>>, %arg2: memref<16x128xbf16, #tpu.memory_space<vmem>>, %arg3: memref<16x128xf32, #tpu.memory_space<vmem>>, %arg4: memref<16x128xf32, #tpu.memory_space<vmem>>, %arg5: memref<1x8x128xf32, #tpu.memory_space<vmem>>, %arg6: memref<1x8x128xf32, #tpu.memory_space<vmem>>, %arg7: memref<1x8x128xf32, #tpu.memory_space<vmem>>, %arg8: memref<1x8x128xf32, #tpu.memory_space<vmem>>) attributes {dimension_semantics = [#tpu.dimension_semantics<parallel>], iteration_bounds = array<i64: 1>, scalar_prefetch = 0 : i64, scratch_operands = 0 : i64, tpu.core_type = #tpu.core_type<tc>, window_params = [{transform_indices = @transform_0, window_bounds = array<i64: 16, 128>}, {transform_indices = @transform_1, window_bounds = array<i64: 16, 128>}, {transform_indices = @transform_2, window_bounds = array<i64: 16, 128>}, {transform_indices = @transform_3, window_bounds = array<i64: 16, 128>}, {transform_indices = @transform_4, window_bounds = array<i64: 1, 8, 128>}, {transform_indices = @transform_5, window_bounds = array<i64: 1, 8, 128>}, {transform_indices = @transform_6, window_bounds = array<i64: 1, 8, 128>}, {transform_indices = @transform_7, window_bounds = array<i64: 1, 8, 128>}]} {
    %c0 = arith.constant 0 : index
    %c0_0 = arith.constant 0 : index
    %0 = vector.load %arg1[%c0, %c0_0] : memref<16x128xf32, #tpu.memory_space<vmem>>, vector<16x128xf32>
    %c0_1 = arith.constant 0 : index
    %c0_2 = arith.constant 0 : index
    %1 = vector.load %arg2[%c0_1, %c0_2] : memref<16x128xbf16, #tpu.memory_space<vmem>>, vector<16x128xbf16>
    %2 = arith.extf %1 : vector<16x128xbf16> to vector<16x128xf32>
    %c0_3 = arith.constant 0 : index
    %c0_4 = arith.constant 0 : index
    %3 = vector.load %arg3[%c0_3, %c0_4] : memref<16x128xf32, #tpu.memory_space<vmem>>, vector<16x128xf32>
    %cst = arith.constant 1.000000e+00 : f32
    %4 = vector.broadcast %cst : f32 to vector<16x128xf32>
    %5 = arith.cmpf oeq, %2, %4 : vector<16x128xf32>
    %6 = arith.extui %5 : vector<16x128xi1> to vector<16x128xi32>
    %7 = arith.sitofp %6 : vector<16x128xi32> to vector<16x128xf32>
    %cst_5 = arith.constant 0.000000e+00 : f32
    %8 = vector.broadcast %cst_5 : f32 to vector<16x128xf32>
    %9 = arith.cmpf oeq, %2, %8 : vector<16x128xf32>
    %10 = arith.extui %9 : vector<16x128xi1> to vector<16x128xi32>
    %11 = arith.sitofp %10 : vector<16x128xi32> to vector<16x128xf32>
    %cst_6 = arith.constant 1.000000e+00 : f32
    %12 = vector.broadcast %cst_6 : f32 to vector<16x128xf32>
    %13 = arith.cmpf oeq, %2, %12 : vector<16x128xf32>
    %cst_7 = arith.constant 1.000000e+00 : f32
    %14 = vector.broadcast %cst_7 : f32 to vector<16x128xf32>
    %15 = arith.subf %14, %0 : vector<16x128xf32>
    %16 = arith.select %13, %0, %15 : vector<16x128xi1>, vector<16x128xf32>
    %17 = math.log %16 : vector<16x128xf32>
    %cst_8 = arith.constant -1.000000e+02 : f32
    %18 = vector.broadcast %cst_8 : f32 to vector<16x128xf32>
    %19 = arith.maximumf %17, %18 : vector<16x128xf32>
    %cst_9 = arith.constant 0.000000e+00 : f32
    %20 = vector.broadcast %cst_9 : f32 to vector<16x128xf32>
    %21 = arith.subf %20, %19 : vector<16x128xf32>
    %22 = arith.mulf %21, %3 : vector<16x128xf32>
    %23 = arith.mulf %22, %11 : vector<16x128xf32>
    %c0_10 = arith.constant 0 : index
    %c0_11 = arith.constant 0 : index
    %24 = vector.load %arg4[%c0_10, %c0_11] : memref<16x128xf32, #tpu.memory_space<vmem>>, vector<16x128xf32>
    tpu.vector_store %arg4[%c0_10, %c0_11], %23 {strides = array<i32>} : memref<16x128xf32, #tpu.memory_space<vmem>>, vector<16x128xf32>,
    %25 = arith.mulf %22, %7 : vector<16x128xf32>
    %26 = vector.shape_cast %25 : vector<16x128xf32> to vector<2x8x128xf32>
    %cst_12 = arith.constant dense<0.000000e+00> : vector<8x128xf32>
    %27 = vector.multi_reduction <add>, %26, %cst_12 [0] : vector<2x8x128xf32> to vector<8x128xf32>
    %28 = vector.shape_cast %27 : vector<8x128xf32> to vector<1x8x128xf32>
    %c0_13 = arith.constant 0 : index
    %c0_14 = arith.constant 0 : index
    %c0_15 = arith.constant 0 : index
    %29 = vector.load %arg5[%c0_13, %c0_14, %c0_15] : memref<1x8x128xf32, #tpu.memory_space<vmem>>, vector<1x8x128xf32>
    tpu.vector_store %arg5[%c0_13, %c0_14, %c0_15], %28 {strides = array<i32>} : memref<1x8x128xf32, #tpu.memory_space<vmem>>, vector<1x8x128xf32>,
    %30 = vector.shape_cast %7 : vector<16x128xf32> to vector<2x8x128xf32>
    %cst_16 = arith.constant dense<0.000000e+00> : vector<8x128xf32>
    %31 = vector.multi_reduction <add>, %30, %cst_16 [0] : vector<2x8x128xf32> to vector<8x128xf32>
    %32 = vector.shape_cast %31 : vector<8x128xf32> to vector<1x8x128xf32>
    %c0_17 = arith.constant 0 : index
    %c0_18 = arith.constant 0 : index
    %c0_19 = arith.constant 0 : index
    %33 = vector.load %arg6[%c0_17, %c0_18, %c0_19] : memref<1x8x128xf32, #tpu.memory_space<vmem>>, vector<1x8x128xf32>
    tpu.vector_store %arg6[%c0_17, %c0_18, %c0_19], %32 {strides = array<i32>} : memref<1x8x128xf32, #tpu.memory_space<vmem>>, vector<1x8x128xf32>,
    %34 = vector.shape_cast %11 : vector<16x128xf32> to vector<2x8x128xf32>
    %cst_20 = arith.constant dense<0.000000e+00> : vector<8x128xf32>
    %35 = vector.multi_reduction <add>, %34, %cst_20 [0] : vector<2x8x128xf32> to vector<8x128xf32>
    %36 = vector.shape_cast %35 : vector<8x128xf32> to vector<1x8x128xf32>
    %c0_21 = arith.constant 0 : index
    %c0_22 = arith.constant 0 : index
    %c0_23 = arith.constant 0 : index
    %37 = vector.load %arg7[%c0_21, %c0_22, %c0_23] : memref<1x8x128xf32, #tpu.memory_space<vmem>>, vector<1x8x128xf32>
    tpu.vector_store %arg7[%c0_21, %c0_22, %c0_23], %36 {strides = array<i32>} : memref<1x8x128xf32, #tpu.memory_space<vmem>>, vector<1x8x128xf32>,
    %38 = vector.shape_cast %23 : vector<16x128xf32> to vector<2x8x128xf32>
    %cst_24 = arith.constant dense<0xFF800000> : vector<8x128xf32>
    %39 = vector.multi_reduction <maximumf>, %38, %cst_24 [0] : vector<2x8x128xf32> to vector<8x128xf32>
    %40 = vector.shape_cast %39 : vector<8x128xf32> to vector<1x8x128xf32>
    %c0_25 = arith.constant 0 : index
    %c0_26 = arith.constant 0 : index
    %c0_27 = arith.constant 0 : index
    %41 = vector.load %arg8[%c0_25, %c0_26, %c0_27] : memref<1x8x128xf32, #tpu.memory_space<vmem>>, vector<1x8x128xf32>
    tpu.vector_store %arg8[%c0_25, %c0_26, %c0_27], %40 {strides = array<i32>} : memref<1x8x128xf32, #tpu.memory_space<vmem>>, vector<1x8x128xf32>,
    return
  }
  func.func @transform_0(%arg0: i32) -> (i32, i32) {
    %c0_i32 = arith.constant 0 : i32
    %c0_i32_0 = arith.constant 0 : i32
    return %arg0, %c0_i32 : i32, i32
  }
  func.func @transform_1(%arg0: i32) -> (i32, i32) {
    %c0_i32 = arith.constant 0 : i32
    %c0_i32_0 = arith.constant 0 : i32
    return %arg0, %c0_i32 : i32, i32
  }
  func.func @transform_2(%arg0: i32) -> (i32, i32) {
    %c0_i32 = arith.constant 0 : i32
    %c0_i32_0 = arith.constant 0 : i32
    return %arg0, %c0_i32 : i32, i32
  }
  func.func @transform_3(%arg0: i32) -> (i32, i32) {
    %c0_i32 = arith.constant 0 : i32
    %c0_i32_0 = arith.constant 0 : i32
    return %arg0, %c0_i32 : i32, i32
  }
  func.func @transform_4(%arg0: i32) -> (i32, i32, i32) {
    %c0_i32 = arith.constant 0 : i32
    %c0_i32_0 = arith.constant 0 : i32
    %c0_i32_1 = arith.constant 0 : i32
    return %arg0, %c0_i32, %c0_i32_0 : i32, i32, i32
  }
  func.func @transform_5(%arg0: i32) -> (i32, i32, i32) {
    %c0_i32 = arith.constant 0 : i32
    %c0_i32_0 = arith.constant 0 : i32
    %c0_i32_1 = arith.constant 0 : i32
    return %arg0, %c0_i32, %c0_i32_0 : i32, i32, i32
  }
  func.func @transform_6(%arg0: i32) -> (i32, i32, i32) {
    %c0_i32 = arith.constant 0 : i32
    %c0_i32_0 = arith.constant 0 : i32
    %c0_i32_1 = arith.constant 0 : i32
    return %arg0, %c0_i32, %c0_i32_0 : i32, i32, i32
  }
  func.func @transform_7(%arg0: i32) -> (i32, i32, i32) {
    %c0_i32 = arith.constant 0 : i32
    %c0_i32_0 = arith.constant 0 : i32
    %c0_i32_1 = arith.constant 0 : i32
    return %arg0, %c0_i32, %c0_i32_0 : i32, i32, i32
  }
}

</mosaic_0001>

<bundles_post_ra>
// kernel: balance_bce_loss.1
= control target key start
LH: loop header
LB: loop body
LE: loop exit
PB: predicated region body
PF: predicated region fallthrough
CT: control target
= control target key end

     0   :  { %v100_v7 = vmov 0.0   ;;  %s174_s0 = inlined_call_operand.vmem [shape: f32[16,128], index: 0, kind: input, shape index: {}]   ;;  %s175_s1 = inlined_call_operand.vmem [shape: bf16[16,128], index: 1, kind: input, shape index: {}]   ;;  %s176_s6 = inlined_call_operand.vmem [shape: f32[1,8,128], index: 6, kind: output, shape index: {3}]   ;;  %s177_s5 = inlined_call_operand.vmem [shape: f32[1,8,128], index: 5, kind: output, shape index: {2}]   ;;  %s178_s2 = inlined_call_operand.vmem [shape: f32[16,128], index: 2, kind: input, shape index: {}]   ;;  %s179_s3 = inlined_call_operand.vmem [shape: f32[16,128], index: 3, kind: output, shape index: {0}]   ;;  %s180_s4 = inlined_call_operand.vmem [shape: f32[1,8,128], index: 4, kind: output, shape index: {1}]   ;;  %s181_s7 = inlined_call_operand.vmem [shape: f32[1,8,128], index: 7, kind: output, shape index: {4}]  }
   0x1   :  { %v19_v0 = vld [vmem:[%s174_s0] sm:$0xff]  ;;  %v20_v4 = vld [vmem:[%s174_s0 + $0x8] sm:$0xff] }
   0x2   :  { %v92_v1 = vld [vmem:[%s175_s1] sm:$0xff]   ;;  %v39_v3 = vsub.f32 1.0, %v19_v0  ;;  %v40_v6 = vsub.f32 1.0, %v20_v4  ;;  %v26_v24 = vld [vmem:[%s178_s2 + $0x8] sm:$0xff] }
   0x3   :  { %v93_v2 = vunpack.c.l.bf16 %v92_v1  ;;  %v94_v5 = vunpack.c.h.bf16 %v92_v1  ;;  %v25_v21 = vld [vmem:[%s178_s2] sm:$0xff] }
   0x5   :  { %vm27_vm0 = vcmp.eq.f32.partialorder %v93_v2, 1.0  ;;  %vm33_vm1 = vcmp.eq.f32.partialorder %v93_v2, 0.0  ;;  %vm28_vm2 = vcmp.eq.f32.partialorder %v94_v5, 1.0  ;;  %vm34_vm3 = vcmp.eq.f32.partialorder %v94_v5, 0.0 }
   0x6   :  { %v89_v8 = vsel %vm33_vm1, 1.0, %v100_v7  ;;  %v41_v9 = vsel %vm27_vm0, %v19_v0, %v39_v3  ;;  %v90_v10 = vsel %vm34_vm3, 1.0, %v100_v7  ;;  %v42_v11 = vsel %vm28_vm2, %v20_v4, %v40_v6 }
   0x7   :  { %96 = vlog2.f32 %v41_v9  ;;  %v87_v12 = vsel %vm27_vm0, 1.0, %v100_v7  ;;  %v88_v13 = vsel %vm28_vm2, 1.0, %v100_v7  ;;  %v63_v14 = vadd.f32 %v90_v10, %v89_v8 }
   0x8   :  { %98 = vlog2.f32 %v42_v11  ;;  %v61_v15 = vadd.f32 %v88_v13, %v87_v12 }
   0x9   :  { %64 = vst [vmem:[%s176_s6] sm:$0xff] %v63_v14 }
   0xa   :  { %62 = vst [vmem:[%s177_s5] sm:$0xff] %v61_v15 }
  0x11   :  { %v97_v16 = vpop.eup %96 }
  0x12   :  { %v99_v17 = vpop.eup %98  ;;  %v44_v18 = vmul.f32 0.6931472, %v97_v16 }
  0x13   :  { %v46_v19 = vmul.f32 0.6931472, %v99_v17 }
  0x14   :  { %v47_v20 = vmax.f32 %v44_v18, -100.0 }
  0x15   :  { %v48_v22 = vmax.f32 %v46_v19, -100.0 }
  0x16   :  { %v49_v23 = vsub.f32 0.0, %v47_v20 }
  0x17   :  { %v50_v25 = vsub.f32 0.0, %v48_v22 }
  0x18   :  { %v51_v26 = vmul.f32 %v49_v23, %v25_v21 }
  0x19   :  { %v52_v27 = vmul.f32 %v50_v25, %v26_v24 }
  0x1a   :  { %v53_v28 = vmul.f32 %v89_v8, %v51_v26  ;;  %v57_v29 = vmul.f32 %v87_v12, %v51_v26 }
  0x1b   :  { %v54_v30 = vmul.f32 %v90_v10, %v52_v27  ;;  %v58_v31 = vmul.f32 %v88_v13, %v52_v27 }
  0x1c   :  { %55 = vst [vmem:[%s179_s3] sm:$0xff] %v53_v28 }
  0x1d   :  { %56 = vst [vmem:[%s179_s3 + $0x8] sm:$0xff] %v54_v30  ;;  %v59_v32 = vadd.f32 %v58_v31, %v57_v29  ;;  %v65_v33 = vmax.f32 %v53_v28, %v54_v30 }
  0x1f   :  { %60 = vst [vmem:[%s180_s4] sm:$0xff] %v59_v32  ;;  %66 = vst [vmem:[%s181_s7] sm:$0xff] %v65_v33 }

</bundles_post_ra>
